<compile_context>
chip_gen: v6e
topology: v6e:2x2x1
jax: 0.10.0
libtpu: 0.0.40
codegen_flags: <defaults>
</compile_context>

<pallas_src>
import functools

import jax
import jax.numpy as jnp
from jax import lax
from jax.experimental import pallas as pl
from jax.experimental.pallas import tpu as pltpu

MIB = 1024 * 1024


# ----------------------------------------------------------------------------
# helpers
# ----------------------------------------------------------------------------
def _round_up(x, m):
    return (x + m - 1) // m * m


def _vmem_capacity_bytes():
    try:
        return int(pltpu.get_tpu_info().vmem_capacity_bytes)
    except Exception:
        return 64 * MIB  # conservative fallback (v7x per-TC VMEM)


def _choose_tiles(N, Cin, Cout, HW, block_budget_bytes,
                  x_target_bytes=4 * MIB, max_bn=8):
    """Byte-targeted tiling: grow the HW tile until the f32 X block is ~4 MiB
    (or H*W is covered); if one tile covers all of H*W and the block is still
    small, block several batch rows (bn | N) per grid step."""
    hw_cap = _round_up(HW, 128)
    per_row_lane_bytes = max(Cin, 1) * 4          # one f32 X column per batch row
    tile_hw = _round_up(max(128, x_target_bytes // per_row_lane_bytes), 128)
    tile_hw = min(tile_hw, hw_cap)

    def blocks_bytes(bn, t):
        x_blk = bn * Cin * t * 4                  # f32 input block (bf16 cast in-kernel)
        o_blk = bn * Cout * t * 4                 # f32 output block (pass 2)
        w_blk = Cout * Cin * 2                    # bf16 resident weight
        small = 4 * Cout * 4 * 16                 # scale/shift/psum blocks (tiny)
        return 2 * x_blk + 2 * o_blk + 2 * w_blk + small

    while tile_hw > 128 and blocks_bytes(1, tile_hw) > block_budget_bytes:
        tile_hw -= 128

    bn = 1
    if tile_hw >= hw_cap:                          # one tile covers all of H*W
        for cand in range(min(N, max_bn), 1, -1):
            if (N % cand == 0
                    and blocks_bytes(cand, tile_hw) <= block_budget_bytes
                    and cand * Cin * tile_hw * 4 <= 2 * x_target_bytes):
                bn = cand
                break
    return bn, tile_hw


# ----------------------------------------------------------------------------
# Kernel 1: partial per-channel sum / sum-of-squares of the 1x1-conv output.
#   y = W @ x_tile (bf16 in, f32 acc on MXU); accumulate over the HW-tile axis
#   into a per-(batch-row, hw-chunk) resident (Cout, 1) accumulator.
# Grid: (N/bn, hw_chunks, tiles_per_chunk) — ("parallel","parallel","arbitrary")
# so both v7x TensorCores get work even at N = 1.
# ----------------------------------------------------------------------------
def conv_stats_kernel(x_ref, w_ref, psum_ref, psumsq_ref, *,
                      bn, tile_hw, tiles_per_chunk, hw_valid, need_mask,
                      conv_dtype):
    c = pl.program_id(1)
    j = pl.program_id(2)

    @pl.when(j == 0)
    def _():
        psum_ref[...] = jnp.zeros_like(psum_ref)
        psumsq_ref[...] = jnp.zeros_like(psumsq_ref)

    w = w_ref[...]                                             # (Cout, Cin)
    cout = w.shape[0]
    if need_mask:
        # Ragged last HW tile: out-of-bounds columns read unspecified values;
        # zero their contribution so stats divided by the true count stay exact.
        col0 = (c * tiles_per_chunk + j) * tile_hw
        col = col0 + lax.broadcasted_iota(jnp.int32, (cout, tile_hw), 1)
        valid = col < hw_valid

    for b in range(bn):                                        # bn is small & static
        xb = x_ref[b].astype(conv_dtype)                       # (Cin, tile_hw)
        y = jnp.dot(w, xb, preferred_element_type=jnp.float32)  # (Cout, tile_hw)
        if need_mask:
            y = jnp.where(valid, y, 0.0)
        psum_ref[b, 0] += jnp.sum(y, axis=1, keepdims=True)         # (Cout, 1)
        psumsq_ref[b, 0] += jnp.sum(y * y, axis=1, keepdims=True)   # (Cout, 1)


# ----------------------------------------------------------------------------
# Kernel 2: recompute the conv tile, apply folded BN affine + ReLU.
#   out = max(scale * (W @ x) + shift, 0)
# Output block (bn, Cout, tile_hw): lane-dense, natively NCHW; out-of-bounds
# columns of the ragged last tile are dropped by Pallas on store.
# ----------------------------------------------------------------------------
def bn_relu_kernel(x_ref, w_ref, scale_ref, shift_ref, o_ref, *, bn, conv_dtype):
    w = w_ref[...]
    scale = scale_ref[...]                                     # (Cout, 1)
    shift = shift_ref[...]
    for b in range(bn):
        xb = x_ref[b].astype(conv_dtype)                       # (Cin, tile_hw)
        y = jnp.dot(w, xb, preferred_element_type=jnp.float32)
        o_ref[b] = jnp.maximum(y * scale + shift, 0.0).astype(o_ref.dtype)


# ----------------------------------------------------------------------------
# Wrapper
# ----------------------------------------------------------------------------
def spatio_conv_forward(x_nchw, w_oi, gamma, beta, *, eps=1e-5,
                        out_dtype=jnp.float32, conv_dtype=jnp.bfloat16):
    """x_nchw: (N, Cin, H, W) f32; w_oi: (Cout, Cin) f32 (1x1 conv weight);
    gamma, beta: (Cout,) f32.  Returns (N, Cout, H, W) in out_dtype.
    conv_dtype: MXU input precision (bf16 default; matches the reference;
    set jnp.float32 for bit-closer agreement with an f32 PyTorch module).
    out_dtype may be set to bf16 if downstream accepts it (halves the only
    mandatory store)."""
    N, Cin, H, W = x_nchw.shape
    Cout = w_oi.shape[0]
    HW = H * W
    M = N * HW                                     # true pixel count for BN stats

    # Generation-aware VMEM budgets (v5e/v6e: 128 MiB physical, v7x: 64 MiB/TC).
    cap = _vmem_capacity_bytes()
    if cap >= 100 * MIB:
        block_budget, vmem_limit = 96 * MIB, 100 * MIB
    else:
        block_budget, vmem_limit = 40 * MIB, 48 * MIB

    bn, tile_hw = _choose_tiles(N, Cin, Cout, HW, block_budget)
    NB = N // bn
    num_hw_tiles = pl.cdiv(HW, tile_hw)
    need_mask = (num_hw_tiles * tile_hw != HW)
    hw_chunks = 2 if (num_hw_tiles % 2 == 0 and num_hw_tiles >= 2) else 1
    tiles_per_chunk = num_hw_tiles // hw_chunks

    # NCHW -> (N, Cin, H*W) is a free reshape; X stays f32 in HBM (no cast pass).
    x3 = x_nchw.reshape(N, Cin, HW)
    w2 = w_oi.astype(conv_dtype)                   # tiny (Cout, Cin)

    # ---------------- Pass 1: partial per-channel statistics ----------------
    x_spec1 = pl.BlockSpec((bn, Cin, tile_hw),
                           lambda n, c, j: (n, 0, c * tiles_per_chunk + j))
    w_spec1 = pl.BlockSpec((Cout, Cin), lambda n, c, j: (0, 0))
    psum_spec = pl.BlockSpec((bn, 1, Cout, 1), lambda n, c, j: (n, c, 0, 0))

    psum, psumsq = pl.pallas_call(
        functools.partial(conv_stats_kernel, bn=bn, tile_hw=tile_hw,
                          tiles_per_chunk=tiles_per_chunk, hw_valid=HW,
                          need_mask=need_mask, conv_dtype=conv_dtype),
        out_shape=(
            jax.ShapeDtypeStruct((N, hw_chunks, Cout, 1), jnp.float32),
            jax.ShapeDtypeStruct((N, hw_chunks, Cout, 1), jnp.float32),
        ),
        grid_spec=pltpu.PrefetchScalarGridSpec(
            num_scalar_prefetch=0,
            grid=(NB, hw_chunks, tiles_per_chunk),
            in_specs=[x_spec1, w_spec1],
            out_specs=[psum_spec, psum_spec],
        ),
        compiler_params=pltpu.CompilerParams(
            dimension_semantics=("parallel", "parallel", "arbitrary"),
            vmem_limit_bytes=vmem_limit),
    )(x3, w2)

    # Tiny O(Cout) final reduction + BN affine fold (outside the kernels).
    csum = jnp.sum(psum, axis=(0, 1))              # (Cout, 1)
    csumsq = jnp.sum(psumsq, axis=(0, 1))          # (Cout, 1)
    mean = csum / jnp.float32(M)
    var = jnp.maximum(csumsq / jnp.float32(M) - mean * mean, 0.0)  # clamp cancellation
    inv_std = lax.rsqrt(var + jnp.float32(eps))
    scale = gamma.reshape(Cout, 1).astype(jnp.float32) * inv_std
    shift = beta.reshape(Cout, 1).astype(jnp.float32) - mean * scale

    # ---------------- Pass 2: recompute conv tile, normalize + ReLU ---------
    x_spec2 = pl.BlockSpec((bn, Cin, tile_hw), lambda n, j: (n, 0, j))
    w_spec2 = pl.BlockSpec((Cout, Cin), lambda n, j: (0, 0))
    vec_spec = pl.BlockSpec((Cout, 1), lambda n, j: (0, 0))
    out_spec = pl.BlockSpec((bn, Cout, tile_hw), lambda n, j: (n, 0, j))

    out3 = pl.pallas_call(
        functools.partial(bn_relu_kernel, bn=bn, conv_dtype=conv_dtype),
        out_shape=jax.ShapeDtypeStruct((N, Cout, HW), out_dtype),
        grid_spec=pltpu.PrefetchScalarGridSpec(
            num_scalar_prefetch=0,
            grid=(NB, num_hw_tiles),
            in_specs=[x_spec2, w_spec2, vec_spec, vec_spec],
            out_specs=out_spec,
        ),
        compiler_params=pltpu.CompilerParams(
            dimension_semantics=("parallel", "parallel"),
            vmem_limit_bytes=vmem_limit),
    )(x3, w2, scale, shift)

    # Free reshape back to NCHW (no slicing: output was written at exact size).
    return out3.reshape(N, Cout, H, W)


# ----------------------------------------------------------------------------
# Pure-JAX reference (same semantics as the PyTorch module in training mode:
# conv1x1 no bias -> BN with batch stats -> ReLU), using the same
# bf16-in / f32-accumulate precision as the kernel's MXU path.
# ----------------------------------------------------------------------------
def spatio_conv_reference(x_nchw, w_oi, gamma, beta, eps=1e-5):
    y = jnp.einsum("nchw,oc->nohw",
                   x_nchw.astype(jnp.bfloat16),
                   w_oi.astype(jnp.bfloat16),
                   preferred_element_type=jnp.float32)
    mean = jnp.mean(y, axis=(0, 2, 3), keepdims=True)
    var = jnp.mean((y - mean) ** 2, axis=(0, 2, 3), keepdims=True)
    yhat = (y - mean) * lax.rsqrt(var + eps)
    out = yhat * gamma[None, :, None, None] + beta[None, :, None, None]
    return jnp.maximum(out, 0.0)


if __name__ == "__main__":
    key = jax.random.PRNGKey(0)
    k_x, k_w = jax.random.split(key)

    N, Cin, H, W = 2, 4, 16, 16
    Cout = 8

    x = jax.random.normal(k_x, (N, Cin, H, W), dtype=jnp.float32)
    # deterministic conv weight init (1x1 kernel stored as (Cout, Cin))
    fan_in = Cin  # kernel_size = 1x1
    bound = 1.0 / (fan_in ** 0.5)
    w = jax.random.uniform(k_w, (Cout, Cin), minval=-bound, maxval=bound,
                           dtype=jnp.float32)
    # non-trivial BN affine params to exercise the scale/shift path
    gamma = 1.0 + 0.05 * jnp.arange(Cout, dtype=jnp.float32)
    beta = 0.02 * jnp.arange(Cout, dtype=jnp.float32) - 0.05

    out = spatio_conv_forward(x, w, gamma, beta)
    out = jax.block_until_ready(out)

    ref = spatio_conv_reference(x, w, gamma, beta)
    assert out.shape == (N, Cout, H, W)
    assert out.dtype == jnp.float32
    assert jnp.allclose(out, ref, atol=2e-3, rtol=2e-3), "mismatch vs reference"

    print("KERNEL_OK")
</pallas_src>

<mosaic_0001>
module attributes {stable_mosaic.version = 11 : i64} {
  func.func @conv_stats_kernel(%arg0: i32, %arg1: i32, %arg2: i32, %arg3: memref<2x4x256xf32, #tpu.memory_space<vmem>>, %arg4: memref<8x4xbf16, #tpu.memory_space<vmem>>, %arg5: memref<2x1x8x1xf32, #tpu.memory_space<vmem>>, %arg6: memref<2x1x8x1xf32, #tpu.memory_space<vmem>>) attributes {dimension_semantics = [#tpu.dimension_semantics<parallel>, #tpu.dimension_semantics<parallel>, #tpu.dimension_semantics<arbitrary>], iteration_bounds = array<i64: 1, 1, 1>, scalar_prefetch = 0 : i64, scratch_operands = 0 : i64, tpu.core_type = #tpu.core_type<tc>, window_params = [{transform_indices = @transform_0, window_bounds = array<i64: 2, 4, 256>}, {pipeline_mode = #tpu.pipeline_mode<synchronous>, transform_indices = @transform_1, window_bounds = array<i64: 8, 4>}, {transform_indices = @transform_2, window_bounds = array<i64: 2, 1, 8, 1>}, {transform_indices = @transform_3, window_bounds = array<i64: 2, 1, 8, 1>}]} {
    %c0_i32 = arith.constant 0 : i32
    %0 = arith.cmpi eq, %arg2, %c0_i32 : i32
    %1 = arith.extui %0 : i1 to i32
    %c0_i32_0 = arith.constant 0 : i32
    %2 = arith.cmpi ne, %1, %c0_i32_0 : i32
    scf.if %2 {
      %cst_44 = arith.constant 0.000000e+00 : f32
      %46 = vector.broadcast %cst_44 : f32 to vector<2x1x8x1xf32>
      %c0_45 = arith.constant 0 : index
      %c0_46 = arith.constant 0 : index
      %c0_47 = arith.constant 0 : index
      %c0_48 = arith.constant 0 : index
      %47 = vector.load %arg5[%c0_45, %c0_46, %c0_47, %c0_48] : memref<2x1x8x1xf32, #tpu.memory_space<vmem>>, vector<2x1x8x1xf32>
      tpu.vector_store %arg5[%c0_45, %c0_46, %c0_47, %c0_48], %46 {strides = array<i32>} : memref<2x1x8x1xf32, #tpu.memory_space<vmem>>, vector<2x1x8x1xf32>,
      %cst_49 = arith.constant 0.000000e+00 : f32
      %48 = vector.broadcast %cst_49 : f32 to vector<2x1x8x1xf32>
      %c0_50 = arith.constant 0 : index
      %c0_51 = arith.constant 0 : index
      %c0_52 = arith.constant 0 : index
      %c0_53 = arith.constant 0 : index
      %49 = vector.load %arg6[%c0_50, %c0_51, %c0_52, %c0_53] : memref<2x1x8x1xf32, #tpu.memory_space<vmem>>, vector<2x1x8x1xf32>
      tpu.vector_store %arg6[%c0_50, %c0_51, %c0_52, %c0_53], %48 {strides = array<i32>} : memref<2x1x8x1xf32, #tpu.memory_space<vmem>>, vector<2x1x8x1xf32>,
    } else {
    }
    %c0 = arith.constant 0 : index
    %c0_1 = arith.constant 0 : index
    %3 = vector.load %arg4[%c0, %c0_1] : memref<8x4xbf16, #tpu.memory_space<vmem>>, vector<8x4xbf16>
    %c0_2 = arith.constant 0 : index
    %c0_3 = arith.constant 0 : index
    %c0_4 = arith.constant 0 : index
    %4 = vector.load %arg3[%c0_2, %c0_3, %c0_4] : memref<2x4x256xf32, #tpu.memory_space<vmem>>, vector<1x4x256xf32>
    %5 = vector.shape_cast %4 : vector<1x4x256xf32> to vector<4x256xf32>
    %6 = arith.truncf %5 : vector<4x256xf32> to vector<4x256xbf16>
    %cst = arith.constant dense<0.000000e+00> : vector<8x256xf32>
    %7 = tpu.matmul %3, %6, %cst {dimension_numbers = #tpu.dot_dimension_numbers<[1], [0], [0], [1], [0, 0, 1, 1], [], []>} : vector<8x4xbf16>, vector<4x256xbf16>, vector<8x256xf32> -> vector<8x256xf32>
    %c0_5 = arith.constant 0 : index
    %c0_6 = arith.constant 0 : index
    %c0_7 = arith.constant 0 : index
    %c0_8 = arith.constant 0 : index
    %8 = vector.load %arg5[%c0_5, %c0_6, %c0_7, %c0_8] : memref<2x1x8x1xf32, #tpu.memory_space<vmem>>, vector<1x1x8x1xf32>
    %9 = vector.shape_cast %8 : vector<1x1x8x1xf32> to vector<8x1xf32>
    %cst_9 = arith.constant dense<0.000000e+00> : vector<8xf32>
    %10 = vector.multi_reduction <add>, %7, %cst_9 [1] : vector<8x256xf32> to vector<8xf32>
    %11 = vector.shape_cast %10 : vector<8xf32> to vector<8x1xf32>
    %12 = arith.addf %9, %11 : vector<8x1xf32>
    %c0_10 = arith.constant 0 : index
    %c0_11 = arith.constant 0 : index
    %c0_12 = arith.constant 0 : index
    %c0_13 = arith.constant 0 : index
    %13 = vector.load %arg5[%c0_10, %c0_11, %c0_12, %c0_13] : memref<2x1x8x1xf32, #tpu.memory_space<vmem>>, vector<1x1x8x1xf32>
    %14 = vector.shape_cast %13 : vector<1x1x8x1xf32> to vector<8x1xf32>
    %15 = vector.shape_cast %12 : vector<8x1xf32> to vector<1x1x8x1xf32>
    tpu.vector_store %arg5[%c0_10, %c0_11, %c0_12, %c0_13], %15 {strides = array<i32>} : memref<2x1x8x1xf32, #tpu.memory_space<vmem>>, vector<1x1x8x1xf32>,
    %c0_14 = arith.constant 0 : index
    %c0_15 = arith.constant 0 : index
    %c0_16 = arith.constant 0 : index
    %c0_17 = arith.constant 0 : index
    %16 = vector.load %arg6[%c0_14, %c0_15, %c0_16, %c0_17] : memref<2x1x8x1xf32, #tpu.memory_space<vmem>>, vector<1x1x8x1xf32>
    %17 = vector.shape_cast %16 : vector<1x1x8x1xf32> to vector<8x1xf32>
    %18 = arith.mulf %7, %7 : vector<8x256xf32>
    %cst_18 = arith.constant dense<0.000000e+00> : vector<8xf32>
    %19 = vector.multi_reduction <add>, %18, %cst_18 [1] : vector<8x256xf32> to vector<8xf32>
    %20 = vector.shape_cast %19 : vector<8xf32> to vector<8x1xf32>
    %21 = arith.addf %17, %20 : vector<8x1xf32>
    %c0_19 = arith.constant 0 : index
    %c0_20 = arith.constant 0 : index
    %c0_21 = arith.constant 0 : index
    %c0_22 = arith.constant 0 : index
    %22 = vector.load %arg6[%c0_19, %c0_20, %c0_21, %c0_22] : memref<2x1x8x1xf32, #tpu.memory_space<vmem>>, vector<1x1x8x1xf32>
    %23 = vector.shape_cast %22 : vector<1x1x8x1xf32> to vector<8x1xf32>
    %24 = vector.shape_cast %21 : vector<8x1xf32> to vector<1x1x8x1xf32>
    tpu.vector_store %arg6[%c0_19, %c0_20, %c0_21, %c0_22], %24 {strides = array<i32>} : memref<2x1x8x1xf32, #tpu.memory_space<vmem>>, vector<1x1x8x1xf32>,
    %c1 = arith.constant 1 : index
    %c0_23 = arith.constant 0 : index
    %c0_24 = arith.constant 0 : index
    %25 = vector.load %arg3[%c1, %c0_23, %c0_24] : memref<2x4x256xf32, #tpu.memory_space<vmem>>, vector<1x4x256xf32>
    %26 = vector.shape_cast %25 : vector<1x4x256xf32> to vector<4x256xf32>
    %27 = arith.truncf %26 : vector<4x256xf32> to vector<4x256xbf16>
    %cst_25 = arith.constant dense<0.000000e+00> : vector<8x256xf32>
    %28 = tpu.matmul %3, %27, %cst_25 {dimension_numbers = #tpu.dot_dimension_numbers<[1], [0], [0], [1], [0, 0, 1, 1], [], []>} : vector<8x4xbf16>, vector<4x256xbf16>, vector<8x256xf32> -> vector<8x256xf32>
    %c1_26 = arith.constant 1 : index
    %c0_27 = arith.constant 0 : index
    %c0_28 = arith.constant 0 : index
    %c0_29 = arith.constant 0 : index
    %29 = vector.load %arg5[%c1_26, %c0_27, %c0_28, %c0_29] : memref<2x1x8x1xf32, #tpu.memory_space<vmem>>, vector<1x1x8x1xf32>
    %30 = vector.shape_cast %29 : vector<1x1x8x1xf32> to vector<8x1xf32>
    %cst_30 = arith.constant dense<0.000000e+00> : vector<8xf32>
    %31 = vector.multi_reduction <add>, %28, %cst_30 [1] : vector<8x256xf32> to vector<8xf32>
    %32 = vector.shape_cast %31 : vector<8xf32> to vector<8x1xf32>
    %33 = arith.addf %30, %32 : vector<8x1xf32>
    %c1_31 = arith.constant 1 : index
    %c0_32 = arith.constant 0 : index
    %c0_33 = arith.constant 0 : index
    %c0_34 = arith.constant 0 : index
    %34 = vector.load %arg5[%c1_31, %c0_32, %c0_33, %c0_34] : memref<2x1x8x1xf32, #tpu.memory_space<vmem>>, vector<1x1x8x1xf32>
    %35 = vector.shape_cast %34 : vector<1x1x8x1xf32> to vector<8x1xf32>
    %36 = vector.shape_cast %33 : vector<8x1xf32> to vector<1x1x8x1xf32>
    tpu.vector_store %arg5[%c1_31, %c0_32, %c0_33, %c0_34], %36 {strides = array<i32>} : memref<2x1x8x1xf32, #tpu.memory_space<vmem>>, vector<1x1x8x1xf32>,
    %c1_35 = arith.constant 1 : index
    %c0_36 = arith.constant 0 : index
    %c0_37 = arith.constant 0 : index
    %c0_38 = arith.constant 0 : index
    %37 = vector.load %arg6[%c1_35, %c0_36, %c0_37, %c0_38] : memref<2x1x8x1xf32, #tpu.memory_space<vmem>>, vector<1x1x8x1xf32>
    %38 = vector.shape_cast %37 : vector<1x1x8x1xf32> to vector<8x1xf32>
    %39 = arith.mulf %28, %28 : vector<8x256xf32>
    %cst_39 = arith.constant dense<0.000000e+00> : vector<8xf32>
    %40 = vector.multi_reduction <add>, %39, %cst_39 [1] : vector<8x256xf32> to vector<8xf32>
    %41 = vector.shape_cast %40 : vector<8xf32> to vector<8x1xf32>
    %42 = arith.addf %38, %41 : vector<8x1xf32>
    %c1_40 = arith.constant 1 : index
    %c0_41 = arith.constant 0 : index
    %c0_42 = arith.constant 0 : index
    %c0_43 = arith.constant 0 : index
    %43 = vector.load %arg6[%c1_40, %c0_41, %c0_42, %c0_43] : memref<2x1x8x1xf32, #tpu.memory_space<vmem>>, vector<1x1x8x1xf32>
    %44 = vector.shape_cast %43 : vector<1x1x8x1xf32> to vector<8x1xf32>
    %45 = vector.shape_cast %42 : vector<8x1xf32> to vector<1x1x8x1xf32>
    tpu.vector_store %arg6[%c1_40, %c0_41, %c0_42, %c0_43], %45 {strides = array<i32>} : memref<2x1x8x1xf32, #tpu.memory_space<vmem>>, vector<1x1x8x1xf32>,
    return
  }
  func.func @transform_0(%arg0: i32, %arg1: i32, %arg2: i32) -> (i32, i32, i32) {
    %c1_i32 = arith.constant 1 : i32
    %0 = arith.muli %arg1, %c1_i32 : i32
    %1 = arith.addi %0, %arg2 : i32
    %c0_i32 = arith.constant 0 : i32
    %c0_i32_0 = arith.constant 0 : i32
    return %arg0, %c0_i32, %1 : i32, i32, i32
  }
  func.func @transform_1(%arg0: i32, %arg1: i32, %arg2: i32) -> (i32, i32) {
    %c0_i32 = arith.constant 0 : i32
    %c0_i32_0 = arith.constant 0 : i32
    %c0_i32_1 = arith.constant 0 : i32
    return %c0_i32, %c0_i32_0 : i32, i32
  }
  func.func @transform_2(%arg0: i32, %arg1: i32, %arg2: i32) -> (i32, i32, i32, i32) {
    %c0_i32 = arith.constant 0 : i32
    %c0_i32_0 = arith.constant 0 : i32
    %c0_i32_1 = arith.constant 0 : i32
    return %arg0, %arg1, %c0_i32, %c0_i32_0 : i32, i32, i32, i32
  }
  func.func @transform_3(%arg0: i32, %arg1: i32, %arg2: i32) -> (i32, i32, i32, i32) {
    %c0_i32 = arith.constant 0 : i32
    %c0_i32_0 = arith.constant 0 : i32
    %c0_i32_1 = arith.constant 0 : i32
    return %arg0, %arg1, %c0_i32, %c0_i32_0 : i32, i32, i32, i32
  }
}

</mosaic_0001>

<bundles_post_ra>
// kernel: tpu_custom_call.1
= control target key start
LH: loop header
LB: loop body
LE: loop exit
PB: predicated region body
PF: predicated region fallthrough
CT: control target
= control target key end

     0   :  { %9 = vsyncpa [#allocation3], 0  ;;  %s233_s12 = smov [#allocation2]   ;;  %s308_s0 = inlined_call_operand.hbm [shape: f32[2,4,256], index: 0, kind: input, shape index: {}]   ;;  %s309_s1 = inlined_call_operand.vmem [shape: bf16[8,4], index: 1, kind: input, shape index: {}]   ;;  %s310_s2 = inlined_call_operand.vmem [shape: f32[2,1,8,1], index: 2, kind: output, shape index: {0}]   ;;  %s311_s3 = inlined_call_operand.vmem [shape: f32[2,1,8,1], index: 3, kind: output, shape index: {1}]  }
   0x1   :  { %s19_s13 = sshll.u32 %s233_s12, 4  ;;  %s20_s13 = int_to_ptr.vmem [resolvable:$true] %s19_s13 }
   0x2   :  { %s219_s14 = scalar_lea.vmem %s20_s13, 256  ;;  %p224_p1 = scmp.lt.s32.totalorder %s20_s13, %s20_s13 }
   0x3   :  { %p220_p0 = scmp.ne.s32.totalorder %s20_s13, %s219_s14  ;;  %p225_p2 = scmp.lt.s32.totalorder %s219_s14, %s219_s14 }
   0x5   :  { %p226_p3 = por %p225_p2, %p224_p1 }
   0x7   :  { %p227_p4 = pnand %p226_p3, %p220_p0 }
   0x9   :  { %230 = shalt.err (!%p227_p4)
}
   0xa   :  { %s234_s15 = smov 128   ;;  %s235_s16 = smov 8  }
   0xb   :  { %25 = dma.hbm_to_vmem [thread:$0]  %s308_s0, 256, %s20_s13, [#allocation3], %s234_s15, %s234_s15, %s235_s16  }
   0xc   :  { %231 = dma.done.wait [#allocation3], 256  }
   0xd   :  { %232 = vsyncadd [#allocation3], 4294967040  ;;  %v236_v0 = vmov 0   ;;  %v44_v1 = vld [vmem:[#allocation2] sm:$0xff]  ;;  %vm54_vm0 = vcmask 1041408   ;;  %v118_v2 = vld [vmem:[#allocation2 + $0x8] sm:$0xff] }
   0xe   :  { %93 = vmatprep.mubr.bf16.mxu0 %v236_v0  ;;  %162 = vmatprep.mubr.bf16.mxu1 %v236_v0  ;;  %v46_v3 = vcombine.high %v44_v1, %v44_v1  ;;  %v120_v4 = vcombine.high %v118_v2, %v118_v2  ;;  %v48_v5 = vpack.c.bf16 %v44_v1, %v44_v1  ;;  %v43_v11 = vld [vmem:[%s309_s1] sm:$0xf]  ;;  %vm50_vm1 = vcmask 31744  }
   0xf   :  { %v122_v6 = vpack.c.bf16 %v118_v2, %v118_v2  ;;  %vm38_vm2 = vcmask 7168   ;;  %v237_v12 = vmov 0.0  }
  0x10   :  { %v49_v7 = vpack.c.bf16 %v46_v3, %v46_v3  ;;  %v123_v8 = vpack.c.bf16 %v120_v4, %v120_v4  ;;  %v56_v9 = vsel %vm54_vm0, %v48_v5, 0  ;;  %40 = vst.msk [vmem:[%s310_s2 + $0x8] sm:$0xff] %vm38_vm2, %v237_v12  ;;  %39 = vst.msk [vmem:[%s310_s2] sm:$0xff] %vm38_vm2, %v237_v12 }
  0x11   :  { %v125_v10 = vsel %vm54_vm0, %v122_v6, 0  ;;  %41 = vst.msk [vmem:[%s311_s3] sm:$0xff] %vm38_vm2, %v237_v12  ;;  %42 = vst.msk [vmem:[%s311_s3 + $0x8] sm:$0xff] %vm38_vm2, %v237_v12 }
  0x12   :  { %196 = vmatprep.subr.msk.bf16.mxu0 %vm54_vm0, %v49_v7  ;;  %198 = vmatprep.subr.msk.bf16.mxu1 %vm54_vm0, %v123_v8 }
  0x13   :  { %76 = vmatpush1.bf16.msra.mxu0 %v56_v9  ;;  %145 = vmatpush1.bf16.msra.mxu1 %v125_v10 }
  0x16   :  { %197 = vmatmul.mubr.msk.bf16.vlgmr.msra.gmra.mxu0 %vm50_vm1, %v43_v11  ;;  %199 = vmatmul.mubr.msk.bf16.vlgmr.msra.gmra.mxu1 %vm50_vm1, %v43_v11 }
  0x17   :  { %v200_v29 = vld [vmem:[%s310_s2 + $0x8] sm:$0xff]  ;;  %v102_v30 = vld [vmem:[%s310_s2] sm:$0xff] }
  0x18   :  { %v202_v35 = vld [vmem:[%s311_s3 + $0x8] sm:$0xff]  ;;  %v109_v36 = vld [vmem:[%s311_s3] sm:$0xff] }
  0xd6   :  { %v95_v13 = vpop.f32.mrf.mxu0  ;;  %v164_v14 = vpop.f32.mrf.mxu1 }
  0xd7   :  { %v110_v23 = vmul.f32 %v95_v13, %v95_v13  ;;  %v180_v24 = vmul.f32 %v164_v14, %v164_v14 }
  0xd8   :  { %v97_v15 = vpop.f32.mrf.mxu0  ;;  %v166_v16 = vpop.f32.mrf.mxu1 }
  0xd9   :  { %v111_v17 = vmul.f32 %v97_v15, %v97_v15  ;;  %v181_v18 = vmul.f32 %v166_v16, %v166_v16  ;;  %v173_v19 = vadd.f32 %v166_v16, %v164_v14  ;;  %v103_v20 = vadd.f32 %v97_v15, %v95_v13 }
  0xda   :  { %v99_v21 = vpop.f32.mrf.mxu0  ;;  %v168_v22 = vpop.f32.mrf.mxu1 }
  0xdb   :  { %174 = vadd.xlane.f32.xlu1 %v173_v19  ;;  %104 = vadd.xlane.f32.xlu0 %v103_v20  ;;  %v182_v27 = vadd.f32 %v181_v18, %v180_v24  ;;  %v112_v28 = vadd.f32 %v111_v17, %v110_v23 }
  0xdc   :  { %v100_v25 = vpop.f32.mrf.mxu0  ;;  %v169_v26 = vpop.f32.mrf.mxu1 }
  0xdf   :  { %183 = vadd.xlane.f32.xlu1 %v182_v27  ;;  %113 = vadd.xlane.f32.xlu0 %v112_v28 }
 0x164   :  { %v175_v31 = vpop.xlane.xlu1 %174  ;;  %v105_v32 = vpop.xlane.xlu0 %104 }
 0x165   :  { %v176_v33 = vadd.f32 %v200_v29, %v175_v31  ;;  %v106_v34 = vadd.f32 %v105_v32, %v102_v30 }
 0x167   :  { %201 = vst.msk [vmem:[%s310_s2 + $0x8] sm:$0xff] %vm38_vm2, %v176_v33  ;;  %108 = vst.msk [vmem:[%s310_s2] sm:$0xff] %vm38_vm2, %v106_v34 }
 0x168   :  { %v184_v37 = vpop.xlane.xlu1 %183  ;;  %v114_v38 = vpop.xlane.xlu0 %113 }
 0x169   :  { %v185_v39 = vadd.f32 %v202_v35, %v184_v37  ;;  %v115_v40 = vadd.f32 %v114_v38, %v109_v36 }
 0x16b   :  { %203 = vst.msk [vmem:[%s311_s3 + $0x8] sm:$0xff] %vm38_vm2, %v185_v39  ;;  %116 = vst.msk [vmem:[%s311_s3] sm:$0xff] %vm38_vm2, %v115_v40 }
 0x16c   :  { %195 = vsyncpa [#allocation3], 1 }

</bundles_post_ra>
